<compile_context>
chip_gen: v7x
topology: tpu7x:2x2x1
jax: 0.10.0
libtpu: 0.0.40
codegen_flags: <defaults>
</compile_context>

<pallas_src>
import functools

import jax
import jax.numpy as jnp
import numpy as np
from jax.experimental import pallas as pl
from jax.experimental.pallas import tpu as pltpu

_LANE = 128     # cameras per lane row
_MAX_SUB = 128  # max sublanes per block -> 128*128 = 16384 cameras per grid step


def _round_up(x, m):
    return ((x + m - 1) // m) * m


def _learn_pose_kernel(rt_ref, init_ref, out_ref):
    # rt_ref:   (6,  S, 128)  rows = rx, ry, rz, tx, ty, tz   (one camera per (sublane, lane))
    # init_ref: (16, S, 128)  rows = init_c2w[i, j] flattened row-major, per camera
    # out_ref:  (16, S, 128)  rows = (c2w @ init_c2w)[i, j] flattened row-major
    rx, ry, rz = rt_ref[0], rt_ref[1], rt_ref[2]
    tx, ty, tz = rt_ref[3], rt_ref[4], rt_ref[5]

    rx2, ry2, rz2 = rx * rx, ry * ry, rz * rz
    r2 = rx2 + ry2 + rz2                           # |r|^2 (exact, matches K @ K)
    theta = jnp.sqrt(r2) + 1e-15                   # same epsilon as the reference
    inv_t = 1.0 / theta
    a = jnp.sin(theta) * inv_t                     # sin(th)/th            (EUP)
    b = (1.0 - jnp.cos(theta)) * (inv_t * inv_t)   # (1-cos(th))/th^2      (EUP)

    # Rodrigues with the skew closed form K^2 = r r^T - |r|^2 I (pure VPU).
    arx, ary, arz = a * rx, a * ry, a * rz
    brx, bry = b * rx, b * ry                      # hoisted shared products
    bxy, bxz, byz = brx * ry, brx * rz, bry * rz
    R0 = (1.0 - b * (ry2 + rz2), bxy - arz, bxz + ary, tx)
    R1 = (bxy + arz, 1.0 - b * (rx2 + rz2), byz - arx, ty)
    R2 = (bxz - ary, byz + arx, 1.0 - b * (rx2 + ry2), tz)

    # out[i, j] = sum_k c2w[i, k] * init[k, j]; bottom row of c2w is [0,0,0,1].
    # Direct full-vreg stores, narrow live ranges (init rows re-read from VMEM).
    for i, (c0, c1, c2, c3) in enumerate((R0, R1, R2)):
        for j in range(4):
            out_ref[4 * i + j] = (c0 * init_ref[j] + c1 * init_ref[4 + j]
                                  + c2 * init_ref[8 + j] + c3 * init_ref[12 + j])
    out_ref[12:16] = init_ref[12:16]               # last row of out == last row of init


@jax.jit
def _learn_pose_all_impl(r, t, init_c2w):
    num_cams = r.shape[0]

    # Block sizing (static at trace time): cameras padded so the grid divides
    # evenly; block is (rows, block_sub, 128) with block_sub a multiple of 8.
    n_sub_needed = -(-num_cams // _LANE)
    block_sub = min(max(8, _round_up(n_sub_needed, 8)), _MAX_SUB)
    n_sub = _round_up(n_sub_needed, block_sub)
    npad = n_sub * _LANE
    grid = n_sub // block_sub

    # Layout plumbing (fused by jit): cameras -> (sublane, lane), rows leading.
    rt6 = jnp.concatenate([r, t], axis=1)                       # (N, 6)
    rt6 = jnp.pad(rt6, ((0, npad - num_cams), (0, 0)))
    rt = rt6.T.reshape(6, n_sub, _LANE)
    init16 = init_c2w.reshape(num_cams, 16)
    init16 = jnp.pad(init16, ((0, npad - num_cams), (0, 0)))
    init_t = init16.T.reshape(16, n_sub, _LANE)

    out = pl.pallas_call(
        _learn_pose_kernel,
        grid=(grid,),
        in_specs=[
            pl.BlockSpec((6, block_sub, _LANE), lambda i: (0, i, 0)),
            pl.BlockSpec((16, block_sub, _LANE), lambda i: (0, i, 0)),
        ],
        out_specs=pl.BlockSpec((16, block_sub, _LANE), lambda i: (0, i, 0)),
        out_shape=jax.ShapeDtypeStruct((16, n_sub, _LANE), jnp.float32),
        compiler_params=pltpu.CompilerParams(
            # Only shard across v7x's two TCs when there is >1 real grid step.
            dimension_semantics=(("parallel",) if grid > 1 else ("arbitrary",)),
        ),
        # Block footprint is a few MB; default scoped-VMEM limit suffices on
        # v5e (16 MiB), v6e (32 MiB) and v7x (32 MiB scoped / 64 MiB physical).
    )(rt, init_t)

    # Un-pack (fused by jit with whatever consumes the result).
    return out.reshape(16, npad)[:, :num_cams].T.reshape(num_cams, 4, 4)


def learn_pose_all(r, t, init_c2w=None):
    """Compute (num_cams, 4, 4) c2w = [Exp(r) | t] @ init_c2w for every camera."""
    r = jnp.asarray(r, jnp.float32)
    t = jnp.asarray(t, jnp.float32)
    num_cams = r.shape[0]
    if init_c2w is None:
        init_c2w = jnp.tile(jnp.eye(4, dtype=jnp.float32), (num_cams, 1, 1))
    init_c2w = jnp.asarray(init_c2w, jnp.float32)
    return _learn_pose_all_impl(r, t, init_c2w)


def learn_pose_forward(cam_id, r, t, init_c2w=None):
    """Pallas forward of LearnPose.forward(cam_id): returns (4, 4) f32 c2w.

    Note: in a per-camera loop, call learn_pose_all once per step and index
    the cached result instead of calling this per camera.
    """
    return learn_pose_all(r, t, init_c2w)[cam_id]


def _reference_forward(cam_id, r, t, init_c2w):
    """Pure-numpy replica of LearnPose.forward (make_c2w with Rodrigues Exp)."""
    r = np.asarray(r, np.float32)
    t = np.asarray(t, np.float32)
    init_c2w = np.asarray(init_c2w, np.float32)
    rv = r[cam_id]
    tv = t[cam_id]
    K = np.array([[0.0, -rv[2], rv[1]],
                  [rv[2], 0.0, -rv[0]],
                  [-rv[1], rv[0], 0.0]], dtype=np.float32)
    theta = np.linalg.norm(rv) + 1e-15
    R = (np.eye(3, dtype=np.float32)
         + (np.sin(theta) / theta) * K
         + ((1.0 - np.cos(theta)) / theta ** 2) * (K @ K))
    c2w = np.concatenate([R, tv[:, None]], axis=1)
    c2w = np.concatenate([c2w, np.array([[0.0, 0.0, 0.0, 1.0]], np.float32)], axis=0)
    return (c2w @ init_c2w[cam_id]).astype(np.float32)


if __name__ == "__main__":
    key = jax.random.PRNGKey(0)
    k_r, k_t, k_p = jax.random.split(key, 3)

    # nn.Parameter shapes: r, t -> (num_cams, 3); init_c2w -> (num_cams, 4, 4).
    # Module __init__ zero-inits r, t; use small non-zero values so the
    # Rodrigues path is exercised (identical semantics).
    num_cams = 8
    r = 0.1 * jax.random.normal(k_r, (num_cams, 3), dtype=jnp.float32)
    t = jax.random.normal(k_t, (num_cams, 3), dtype=jnp.float32)
    init_c2w = (jnp.tile(jnp.eye(4, dtype=jnp.float32), (num_cams, 1, 1))
                + 0.05 * jax.random.normal(k_p, (num_cams, 4, 4), dtype=jnp.float32))
    # TODO(synk): the np.load(init_c2w) path-string branch of __init__ is file I/O, not compute.

    # Batched: all cameras in one pallas_call, then slice per cam_id.
    all_c2w = jax.block_until_ready(learn_pose_all(r, t, init_c2w))
    assert all_c2w.shape == (num_cams, 4, 4) and all_c2w.dtype == jnp.float32
    for cid in range(num_cams):
        ref = _reference_forward(cid, r, t, init_c2w)
        np.testing.assert_allclose(np.asarray(all_c2w[cid]), ref, rtol=1e-5, atol=1e-5)

    # Single-camera API (matches module forward(cam_id)).
    cam_id = 3
    out = jax.block_until_ready(learn_pose_forward(cam_id, r, t, init_c2w))
    assert out.shape == (4, 4) and out.dtype == jnp.float32
    np.testing.assert_allclose(np.asarray(out),
                               _reference_forward(cam_id, r, t, init_c2w),
                               rtol=1e-5, atol=1e-5)

    # Default zero-init r, t (module default) exercises the theta -> 1e-15 path.
    r0 = jnp.zeros((num_cams, 3), jnp.float32)
    t0 = jnp.zeros((num_cams, 3), jnp.float32)
    out0 = jax.block_until_ready(learn_pose_forward(0, r0, t0, init_c2w))
    np.testing.assert_allclose(np.asarray(out0),
                               _reference_forward(0, r0, t0, init_c2w),
                               rtol=1e-5, atol=1e-5)

    # A camera count spanning several sublane rows (non-multiple of 128).
    n2 = 300
    k2r, k2t, k2p = jax.random.split(jax.random.PRNGKey(1), 3)
    r2 = 0.1 * jax.random.normal(k2r, (n2, 3), dtype=jnp.float32)
    t2 = jax.random.normal(k2t, (n2, 3), dtype=jnp.float32)
    p2 = (jnp.tile(jnp.eye(4, dtype=jnp.float32), (n2, 1, 1))
          + 0.05 * jax.random.normal(k2p, (n2, 4, 4), dtype=jnp.float32))
    all2 = jax.block_until_ready(learn_pose_all(r2, t2, p2))
    for cid in (0, 127, 128, 255, 299):
        np.testing.assert_allclose(np.asarray(all2[cid]),
                                   _reference_forward(cid, r2, t2, p2),
                                   rtol=1e-5, atol=1e-5)

    print("KERNEL_OK")
</pallas_src>

<mosaic_0001>
module attributes {stable_mosaic.version = 11 : i64} {
  func.func @_learn_pose_kernel(%arg0: i32, %arg1: memref<6x8x128xf32, #tpu.memory_space<vmem>>, %arg2: memref<16x8x128xf32, #tpu.memory_space<vmem>>, %arg3: memref<16x8x128xf32, #tpu.memory_space<vmem>>) attributes {dimension_semantics = [#tpu.dimension_semantics<arbitrary>], iteration_bounds = array<i64: 1>, scalar_prefetch = 0 : i64, scratch_operands = 0 : i64, tpu.core_type = #tpu.core_type<tc>, window_params = [{transform_indices = @transform_0, window_bounds = array<i64: 6, 8, 128>}, {transform_indices = @transform_1, window_bounds = array<i64: 16, 8, 128>}, {transform_indices = @transform_2, window_bounds = array<i64: 16, 8, 128>}]} {
    %c0 = arith.constant 0 : index
    %c0_0 = arith.constant 0 : index
    %c0_1 = arith.constant 0 : index
    %0 = vector.load %arg1[%c0, %c0_0, %c0_1] : memref<6x8x128xf32, #tpu.memory_space<vmem>>, vector<1x8x128xf32>
    %1 = vector.shape_cast %0 : vector<1x8x128xf32> to vector<8x128xf32>
    %c1 = arith.constant 1 : index
    %c0_2 = arith.constant 0 : index
    %c0_3 = arith.constant 0 : index
    %2 = vector.load %arg1[%c1, %c0_2, %c0_3] : memref<6x8x128xf32, #tpu.memory_space<vmem>>, vector<1x8x128xf32>
    %3 = vector.shape_cast %2 : vector<1x8x128xf32> to vector<8x128xf32>
    %c2 = arith.constant 2 : index
    %c0_4 = arith.constant 0 : index
    %c0_5 = arith.constant 0 : index
    %4 = vector.load %arg1[%c2, %c0_4, %c0_5] : memref<6x8x128xf32, #tpu.memory_space<vmem>>, vector<1x8x128xf32>
    %5 = vector.shape_cast %4 : vector<1x8x128xf32> to vector<8x128xf32>
    %c3 = arith.constant 3 : index
    %c0_6 = arith.constant 0 : index
    %c0_7 = arith.constant 0 : index
    %6 = vector.load %arg1[%c3, %c0_6, %c0_7] : memref<6x8x128xf32, #tpu.memory_space<vmem>>, vector<1x8x128xf32>
    %7 = vector.shape_cast %6 : vector<1x8x128xf32> to vector<8x128xf32>
    %c4 = arith.constant 4 : index
    %c0_8 = arith.constant 0 : index
    %c0_9 = arith.constant 0 : index
    %8 = vector.load %arg1[%c4, %c0_8, %c0_9] : memref<6x8x128xf32, #tpu.memory_space<vmem>>, vector<1x8x128xf32>
    %9 = vector.shape_cast %8 : vector<1x8x128xf32> to vector<8x128xf32>
    %c5 = arith.constant 5 : index
    %c0_10 = arith.constant 0 : index
    %c0_11 = arith.constant 0 : index
    %10 = vector.load %arg1[%c5, %c0_10, %c0_11] : memref<6x8x128xf32, #tpu.memory_space<vmem>>, vector<1x8x128xf32>
    %11 = vector.shape_cast %10 : vector<1x8x128xf32> to vector<8x128xf32>
    %12 = arith.mulf %1, %1 : vector<8x128xf32>
    %13 = arith.mulf %3, %3 : vector<8x128xf32>
    %14 = arith.mulf %5, %5 : vector<8x128xf32>
    %15 = arith.addf %12, %13 : vector<8x128xf32>
    %16 = arith.addf %15, %14 : vector<8x128xf32>
    %17 = math.sqrt %16 : vector<8x128xf32>
    %cst = arith.constant 1.000000e-15 : f32
    %18 = vector.broadcast %cst : f32 to vector<8x128xf32>
    %19 = arith.addf %17, %18 : vector<8x128xf32>
    %cst_12 = arith.constant 1.000000e+00 : f32
    %20 = vector.broadcast %cst_12 : f32 to vector<8x128xf32>
    %21 = arith.divf %20, %19 : vector<8x128xf32>
    %22 = math.sin %19 : vector<8x128xf32>
    %23 = arith.mulf %22, %21 : vector<8x128xf32>
    %24 = math.cos %19 : vector<8x128xf32>
    %cst_13 = arith.constant 1.000000e+00 : f32
    %25 = vector.broadcast %cst_13 : f32 to vector<8x128xf32>
    %26 = arith.subf %25, %24 : vector<8x128xf32>
    %27 = arith.mulf %21, %21 : vector<8x128xf32>
    %28 = arith.mulf %26, %27 : vector<8x128xf32>
    %29 = arith.mulf %23, %1 : vector<8x128xf32>
    %30 = arith.mulf %23, %3 : vector<8x128xf32>
    %31 = arith.mulf %23, %5 : vector<8x128xf32>
    %32 = arith.mulf %28, %1 : vector<8x128xf32>
    %33 = arith.mulf %28, %3 : vector<8x128xf32>
    %34 = arith.mulf %32, %3 : vector<8x128xf32>
    %35 = arith.mulf %32, %5 : vector<8x128xf32>
    %36 = arith.mulf %33, %5 : vector<8x128xf32>
    %37 = arith.addf %13, %14 : vector<8x128xf32>
    %38 = arith.mulf %28, %37 : vector<8x128xf32>
    %cst_14 = arith.constant 1.000000e+00 : f32
    %39 = vector.broadcast %cst_14 : f32 to vector<8x128xf32>
    %40 = arith.subf %39, %38 : vector<8x128xf32>
    %41 = arith.subf %34, %31 : vector<8x128xf32>
    %42 = arith.addf %35, %30 : vector<8x128xf32>
    %43 = arith.addf %34, %31 : vector<8x128xf32>
    %44 = arith.addf %12, %14 : vector<8x128xf32>
    %45 = arith.mulf %28, %44 : vector<8x128xf32>
    %cst_15 = arith.constant 1.000000e+00 : f32
    %46 = vector.broadcast %cst_15 : f32 to vector<8x128xf32>
    %47 = arith.subf %46, %45 : vector<8x128xf32>
    %48 = arith.subf %36, %29 : vector<8x128xf32>
    %49 = arith.subf %35, %30 : vector<8x128xf32>
    %50 = arith.addf %36, %29 : vector<8x128xf32>
    %51 = arith.addf %12, %13 : vector<8x128xf32>
    %52 = arith.mulf %28, %51 : vector<8x128xf32>
    %cst_16 = arith.constant 1.000000e+00 : f32
    %53 = vector.broadcast %cst_16 : f32 to vector<8x128xf32>
    %54 = arith.subf %53, %52 : vector<8x128xf32>
    %c0_17 = arith.constant 0 : index
    %c0_18 = arith.constant 0 : index
    %c0_19 = arith.constant 0 : index
    %55 = vector.load %arg2[%c0_17, %c0_18, %c0_19] : memref<16x8x128xf32, #tpu.memory_space<vmem>>, vector<1x8x128xf32>
    %56 = vector.shape_cast %55 : vector<1x8x128xf32> to vector<8x128xf32>
    %57 = arith.mulf %40, %56 : vector<8x128xf32>
    %c4_20 = arith.constant 4 : index
    %c0_21 = arith.constant 0 : index
    %c0_22 = arith.constant 0 : index
    %58 = vector.load %arg2[%c4_20, %c0_21, %c0_22] : memref<16x8x128xf32, #tpu.memory_space<vmem>>, vector<1x8x128xf32>
    %59 = vector.shape_cast %58 : vector<1x8x128xf32> to vector<8x128xf32>
    %60 = arith.mulf %41, %59 : vector<8x128xf32>
    %61 = arith.addf %57, %60 : vector<8x128xf32>
    %c8 = arith.constant 8 : index
    %c0_23 = arith.constant 0 : index
    %c0_24 = arith.constant 0 : index
    %62 = vector.load %arg2[%c8, %c0_23, %c0_24] : memref<16x8x128xf32, #tpu.memory_space<vmem>>, vector<1x8x128xf32>
    %63 = vector.shape_cast %62 : vector<1x8x128xf32> to vector<8x128xf32>
    %64 = arith.mulf %42, %63 : vector<8x128xf32>
    %65 = arith.addf %61, %64 : vector<8x128xf32>
    %c12 = arith.constant 12 : index
    %c0_25 = arith.constant 0 : index
    %c0_26 = arith.constant 0 : index
    %66 = vector.load %arg2[%c12, %c0_25, %c0_26] : memref<16x8x128xf32, #tpu.memory_space<vmem>>, vector<1x8x128xf32>
    %67 = vector.shape_cast %66 : vector<1x8x128xf32> to vector<8x128xf32>
    %68 = arith.mulf %7, %67 : vector<8x128xf32>
    %69 = arith.addf %65, %68 : vector<8x128xf32>
    %c0_27 = arith.constant 0 : index
    %c0_28 = arith.constant 0 : index
    %c0_29 = arith.constant 0 : index
    %70 = vector.load %arg3[%c0_27, %c0_28, %c0_29] : memref<16x8x128xf32, #tpu.memory_space<vmem>>, vector<1x8x128xf32>
    %71 = vector.shape_cast %70 : vector<1x8x128xf32> to vector<8x128xf32>
    %72 = vector.shape_cast %69 : vector<8x128xf32> to vector<1x8x128xf32>
    tpu.vector_store %arg3[%c0_27, %c0_28, %c0_29], %72 {strides = array<i32>} : memref<16x8x128xf32, #tpu.memory_space<vmem>>, vector<1x8x128xf32>,
    %c1_30 = arith.constant 1 : index
    %c0_31 = arith.constant 0 : index
    %c0_32 = arith.constant 0 : index
    %73 = vector.load %arg2[%c1_30, %c0_31, %c0_32] : memref<16x8x128xf32, #tpu.memory_space<vmem>>, vector<1x8x128xf32>
    %74 = vector.shape_cast %73 : vector<1x8x128xf32> to vector<8x128xf32>
    %75 = arith.mulf %40, %74 : vector<8x128xf32>
    %c5_33 = arith.constant 5 : index
    %c0_34 = arith.constant 0 : index
    %c0_35 = arith.constant 0 : index
    %76 = vector.load %arg2[%c5_33, %c0_34, %c0_35] : memref<16x8x128xf32, #tpu.memory_space<vmem>>, vector<1x8x128xf32>
    %77 = vector.shape_cast %76 : vector<1x8x128xf32> to vector<8x128xf32>
    %78 = arith.mulf %41, %77 : vector<8x128xf32>
    %79 = arith.addf %75, %78 : vector<8x128xf32>
    %c9 = arith.constant 9 : index
    %c0_36 = arith.constant 0 : index
    %c0_37 = arith.constant 0 : index
    %80 = vector.load %arg2[%c9, %c0_36, %c0_37] : memref<16x8x128xf32, #tpu.memory_space<vmem>>, vector<1x8x128xf32>
    %81 = vector.shape_cast %80 : vector<1x8x128xf32> to vector<8x128xf32>
    %82 = arith.mulf %42, %81 : vector<8x128xf32>
    %83 = arith.addf %79, %82 : vector<8x128xf32>
    %c13 = arith.constant 13 : index
    %c0_38 = arith.constant 0 : index
    %c0_39 = arith.constant 0 : index
    %84 = vector.load %arg2[%c13, %c0_38, %c0_39] : memref<16x8x128xf32, #tpu.memory_space<vmem>>, vector<1x8x128xf32>
    %85 = vector.shape_cast %84 : vector<1x8x128xf32> to vector<8x128xf32>
    %86 = arith.mulf %7, %85 : vector<8x128xf32>
    %87 = arith.addf %83, %86 : vector<8x128xf32>
    %c1_40 = arith.constant 1 : index
    %c0_41 = arith.constant 0 : index
    %c0_42 = arith.constant 0 : index
    %88 = vector.load %arg3[%c1_40, %c0_41, %c0_42] : memref<16x8x128xf32, #tpu.memory_space<vmem>>, vector<1x8x128xf32>
    %89 = vector.shape_cast %88 : vector<1x8x128xf32> to vector<8x128xf32>
    %90 = vector.shape_cast %87 : vector<8x128xf32> to vector<1x8x128xf32>
    tpu.vector_store %arg3[%c1_40, %c0_41, %c0_42], %90 {strides = array<i32>} : memref<16x8x128xf32, #tpu.memory_space<vmem>>, vector<1x8x128xf32>,
    %c2_43 = arith.constant 2 : index
    %c0_44 = arith.constant 0 : index
    %c0_45 = arith.constant 0 : index
    %91 = vector.load %arg2[%c2_43, %c0_44, %c0_45] : memref<16x8x128xf32, #tpu.memory_space<vmem>>, vector<1x8x128xf32>
    %92 = vector.shape_cast %91 : vector<1x8x128xf32> to vector<8x128xf32>
    %93 = arith.mulf %40, %92 : vector<8x128xf32>
    %c6 = arith.constant 6 : index
    %c0_46 = arith.constant 0 : index
    %c0_47 = arith.constant 0 : index
    %94 = vector.load %arg2[%c6, %c0_46, %c0_47] : memref<16x8x128xf32, #tpu.memory_space<vmem>>, vector<1x8x128xf32>
    %95 = vector.shape_cast %94 : vector<1x8x128xf32> to vector<8x128xf32>
    %96 = arith.mulf %41, %95 : vector<8x128xf32>
    %97 = arith.addf %93, %96 : vector<8x128xf32>
    %c10 = arith.constant 10 : index
    %c0_48 = arith.constant 0 : index
    %c0_49 = arith.constant 0 : index
    %98 = vector.load %arg2[%c10, %c0_48, %c0_49] : memref<16x8x128xf32, #tpu.memory_space<vmem>>, vector<1x8x128xf32>
    %99 = vector.shape_cast %98 : vector<1x8x128xf32> to vector<8x128xf32>
    %100 = arith.mulf %42, %99 : vector<8x128xf32>
    %101 = arith.addf %97, %100 : vector<8x128xf32>
    %c14 = arith.constant 14 : index
    %c0_50 = arith.constant 0 : index
    %c0_51 = arith.constant 0 : index
    %102 = vector.load %arg2[%c14, %c0_50, %c0_51] : memref<16x8x128xf32, #tpu.memory_space<vmem>>, vector<1x8x128xf32>
    %103 = vector.shape_cast %102 : vector<1x8x128xf32> to vector<8x128xf32>
    %104 = arith.mulf %7, %103 : vector<8x128xf32>
    %105 = arith.addf %101, %104 : vector<8x128xf32>
    %c2_52 = arith.constant 2 : index
    %c0_53 = arith.constant 0 : index
    %c0_54 = arith.constant 0 : index
    %106 = vector.load %arg3[%c2_52, %c0_53, %c0_54] : memref<16x8x128xf32, #tpu.memory_space<vmem>>, vector<1x8x128xf32>
    %107 = vector.shape_cast %106 : vector<1x8x128xf32> to vector<8x128xf32>
    %108 = vector.shape_cast %105 : vector<8x128xf32> to vector<1x8x128xf32>
    tpu.vector_store %arg3[%c2_52, %c0_53, %c0_54], %108 {strides = array<i32>} : memref<16x8x128xf32, #tpu.memory_space<vmem>>, vector<1x8x128xf32>,
    %c3_55 = arith.constant 3 : index
    %c0_56 = arith.constant 0 : index
    %c0_57 = arith.constant 0 : index
    %109 = vector.load %arg2[%c3_55, %c0_56, %c0_57] : memref<16x8x128xf32, #tpu.memory_space<vmem>>, vector<1x8x128xf32>
    %110 = vector.shape_cast %109 : vector<1x8x128xf32> to vector<8x128xf32>
    %111 = arith.mulf %40, %110 : vector<8x128xf32>
    %c7 = arith.constant 7 : index
    %c0_58 = arith.constant 0 : index
    %c0_59 = arith.constant 0 : index
    %112 = vector.load %arg2[%c7, %c0_58, %c0_59] : memref<16x8x128xf32, #tpu.memory_space<vmem>>, vector<1x8x128xf32>
    %113 = vector.shape_cast %112 : vector<1x8x128xf32> to vector<8x128xf32>
    %114 = arith.mulf %41, %113 : vector<8x128xf32>
    %115 = arith.addf %111, %114 : vector<8x128xf32>
    %c11 = arith.constant 11 : index
    %c0_60 = arith.constant 0 : index
    %c0_61 = arith.constant 0 : index
    %116 = vector.load %arg2[%c11, %c0_60, %c0_61] : memref<16x8x128xf32, #tpu.memory_space<vmem>>, vector<1x8x128xf32>
    %117 = vector.shape_cast %116 : vector<1x8x128xf32> to vector<8x128xf32>
    %118 = arith.mulf %42, %117 : vector<8x128xf32>
    %119 = arith.addf %115, %118 : vector<8x128xf32>
    %c15 = arith.constant 15 : index
    %c0_62 = arith.constant 0 : index
    %c0_63 = arith.constant 0 : index
    %120 = vector.load %arg2[%c15, %c0_62, %c0_63] : memref<16x8x128xf32, #tpu.memory_space<vmem>>, vector<1x8x128xf32>
    %121 = vector.shape_cast %120 : vector<1x8x128xf32> to vector<8x128xf32>
    %122 = arith.mulf %7, %121 : vector<8x128xf32>
    %123 = arith.addf %119, %122 : vector<8x128xf32>
    %c3_64 = arith.constant 3 : index
    %c0_65 = arith.constant 0 : index
    %c0_66 = arith.constant 0 : index
    %124 = vector.load %arg3[%c3_64, %c0_65, %c0_66] : memref<16x8x128xf32, #tpu.memory_space<vmem>>, vector<1x8x128xf32>
    %125 = vector.shape_cast %124 : vector<1x8x128xf32> to vector<8x128xf32>
    %126 = vector.shape_cast %123 : vector<8x128xf32> to vector<1x8x128xf32>
    tpu.vector_store %arg3[%c3_64, %c0_65, %c0_66], %126 {strides = array<i32>} : memref<16x8x128xf32, #tpu.memory_space<vmem>>, vector<1x8x128xf32>,
    %c0_67 = arith.constant 0 : index
    %c0_68 = arith.constant 0 : index
    %c0_69 = arith.constant 0 : index
    %127 = vector.load %arg2[%c0_67, %c0_68, %c0_69] : memref<16x8x128xf32, #tpu.memory_space<vmem>>, vector<1x8x128xf32>
    %128 = vector.shape_cast %127 : vector<1x8x128xf32> to vector<8x128xf32>
    %129 = arith.mulf %43, %128 : vector<8x128xf32>
    %c4_70 = arith.constant 4 : index
    %c0_71 = arith.constant 0 : index
    %c0_72 = arith.constant 0 : index
    %130 = vector.load %arg2[%c4_70, %c0_71, %c0_72] : memref<16x8x128xf32, #tpu.memory_space<vmem>>, vector<1x8x128xf32>
    %131 = vector.shape_cast %130 : vector<1x8x128xf32> to vector<8x128xf32>
    %132 = arith.mulf %47, %131 : vector<8x128xf32>
    %133 = arith.addf %129, %132 : vector<8x128xf32>
    %c8_73 = arith.constant 8 : index
    %c0_74 = arith.constant 0 : index
    %c0_75 = arith.constant 0 : index
    %134 = vector.load %arg2[%c8_73, %c0_74, %c0_75] : memref<16x8x128xf32, #tpu.memory_space<vmem>>, vector<1x8x128xf32>
    %135 = vector.shape_cast %134 : vector<1x8x128xf32> to vector<8x128xf32>
    %136 = arith.mulf %48, %135 : vector<8x128xf32>
    %137 = arith.addf %133, %136 : vector<8x128xf32>
    %c12_76 = arith.constant 12 : index
    %c0_77 = arith.constant 0 : index
    %c0_78 = arith.constant 0 : index
    %138 = vector.load %arg2[%c12_76, %c0_77, %c0_78] : memref<16x8x128xf32, #tpu.memory_space<vmem>>, vector<1x8x128xf32>
    %139 = vector.shape_cast %138 : vector<1x8x128xf32> to vector<8x128xf32>
    %140 = arith.mulf %9, %139 : vector<8x128xf32>
    %141 = arith.addf %137, %140 : vector<8x128xf32>
    %c4_79 = arith.constant 4 : index
    %c0_80 = arith.constant 0 : index
    %c0_81 = arith.constant 0 : index
    %142 = vector.load %arg3[%c4_79, %c0_80, %c0_81] : memref<16x8x128xf32, #tpu.memory_space<vmem>>, vector<1x8x128xf32>
    %143 = vector.shape_cast %142 : vector<1x8x128xf32> to vector<8x128xf32>
    %144 = vector.shape_cast %141 : vector<8x128xf32> to vector<1x8x128xf32>
    tpu.vector_store %arg3[%c4_79, %c0_80, %c0_81], %144 {strides = array<i32>} : memref<16x8x128xf32, #tpu.memory_space<vmem>>, vector<1x8x128xf32>,
    %c1_82 = arith.constant 1 : index
    %c0_83 = arith.constant 0 : index
    %c0_84 = arith.constant 0 : index
    %145 = vector.load %arg2[%c1_82, %c0_83, %c0_84] : memref<16x8x128xf32, #tpu.memory_space<vmem>>, vector<1x8x128xf32>
    %146 = vector.shape_cast %145 : vector<1x8x128xf32> to vector<8x128xf32>
    %147 = arith.mulf %43, %146 : vector<8x128xf32>
    %c5_85 = arith.constant 5 : index
    %c0_86 = arith.constant 0 : index
    %c0_87 = arith.constant 0 : index
    %148 = vector.load %arg2[%c5_85, %c0_86, %c0_87] : memref<16x8x128xf32, #tpu.memory_space<vmem>>, vector<1x8x128xf32>
    %149 = vector.shape_cast %148 : vector<1x8x128xf32> to vector<8x128xf32>
    %150 = arith.mulf %47, %149 : vector<8x128xf32>
    %151 = arith.addf %147, %150 : vector<8x128xf32>
    %c9_88 = arith.constant 9 : index
    %c0_89 = arith.constant 0 : index
    %c0_90 = arith.constant 0 : index
    %152 = vector.load %arg2[%c9_88, %c0_89, %c0_90] : memref<16x8x128xf32, #tpu.memory_space<vmem>>, vector<1x8x128xf32>
    %153 = vector.shape_cast %152 : vector<1x8x128xf32> to vector<8x128xf32>
    %154 = arith.mulf %48, %153 : vector<8x128xf32>
    %155 = arith.addf %151, %154 : vector<8x128xf32>
    %c13_91 = arith.constant 13 : index
    %c0_92 = arith.constant 0 : index
    %c0_93 = arith.constant 0 : index
    %156 = vector.load %arg2[%c13_91, %c0_92, %c0_93] : memref<16x8x128xf32, #tpu.memory_space<vmem>>, vector<1x8x128xf32>
    %157 = vector.shape_cast %156 : vector<1x8x128xf32> to vector<8x128xf32>
    %158 = arith.mulf %9, %157 : vector<8x128xf32>
    %159 = arith.addf %155, %158 : vector<8x128xf32>
    %c5_94 = arith.constant 5 : index
    %c0_95 = arith.constant 0 : index
    %c0_96 = arith.constant 0 : index
    %160 = vector.load %arg3[%c5_94, %c0_95, %c0_96] : memref<16x8x128xf32, #tpu.memory_space<vmem>>, vector<1x8x128xf32>
    %161 = vector.shape_cast %160 : vector<1x8x128xf32> to vector<8x128xf32>
    %162 = vector.shape_cast %159 : vector<8x128xf32> to vector<1x8x128xf32>
    tpu.vector_store %arg3[%c5_94, %c0_95, %c0_96], %162 {strides = array<i32>} : memref<16x8x128xf32, #tpu.memory_space<vmem>>, vector<1x8x128xf32>,
    %c2_97 = arith.constant 2 : index
    %c0_98 = arith.constant 0 : index
    %c0_99 = arith.constant 0 : index
    %163 = vector.load %arg2[%c2_97, %c0_98, %c0_99] : memref<16x8x128xf32, #tpu.memory_space<vmem>>, vector<1x8x128xf32>
    %164 = vector.shape_cast %163 : vector<1x8x128xf32> to vector<8x128xf32>
    %165 = arith.mulf %43, %164 : vector<8x128xf32>
    %c6_100 = arith.constant 6 : index
    %c0_101 = arith.constant 0 : index
    %c0_102 = arith.constant 0 : index
    %166 = vector.load %arg2[%c6_100, %c0_101, %c0_102] : memref<16x8x128xf32, #tpu.memory_space<vmem>>, vector<1x8x128xf32>
    %167 = vector.shape_cast %166 : vector<1x8x128xf32> to vector<8x128xf32>
    %168 = arith.mulf %47, %167 : vector<8x128xf32>
    %169 = arith.addf %165, %168 : vector<8x128xf32>
    %c10_103 = arith.constant 10 : index
    %c0_104 = arith.constant 0 : index
    %c0_105 = arith.constant 0 : index
    %170 = vector.load %arg2[%c10_103, %c0_104, %c0_105] : memref<16x8x128xf32, #tpu.memory_space<vmem>>, vector<1x8x128xf32>
    %171 = vector.shape_cast %170 : vector<1x8x128xf32> to vector<8x128xf32>
    %172 = arith.mulf %48, %171 : vector<8x128xf32>
    %173 = arith.addf %169, %172 : vector<8x128xf32>
    %c14_106 = arith.constant 14 : index
    %c0_107 = arith.constant 0 : index
    %c0_108 = arith.constant 0 : index
    %174 = vector.load %arg2[%c14_106, %c0_107, %c0_108] : memref<16x8x128xf32, #tpu.memory_space<vmem>>, vector<1x8x128xf32>
    %175 = vector.shape_cast %174 : vector<1x8x128xf32> to vector<8x128xf32>
    %176 = arith.mulf %9, %175 : vector<8x128xf32>
    %177 = arith.addf %173, %176 : vector<8x128xf32>
    %c6_109 = arith.constant 6 : index
    %c0_110 = arith.constant 0 : index
    %c0_111 = arith.constant 0 : index
    %178 = vector.load %arg3[%c6_109, %c0_110, %c0_111] : memref<16x8x128xf32, #tpu.memory_space<vmem>>, vector<1x8x128xf32>
    %179 = vector.shape_cast %178 : vector<1x8x128xf32> to vector<8x128xf32>
    %180 = vector.shape_cast %177 : vector<8x128xf32> to vector<1x8x128xf32>
    tpu.vector_store %arg3[%c6_109, %c0_110, %c0_111], %180 {strides = array<i32>} : memref<16x8x128xf32, #tpu.memory_space<vmem>>, vector<1x8x128xf32>,
    %c3_112 = arith.constant 3 : index
    %c0_113 = arith.constant 0 : index
    %c0_114 = arith.constant 0 : index
    %181 = vector.load %arg2[%c3_112, %c0_113, %c0_114] : memref<16x8x128xf32, #tpu.memory_space<vmem>>, vector<1x8x128xf32>
    %182 = vector.shape_cast %181 : vector<1x8x128xf32> to vector<8x128xf32>
    %183 = arith.mulf %43, %182 : vector<8x128xf32>
    %c7_115 = arith.constant 7 : index
    %c0_116 = arith.constant 0 : index
    %c0_117 = arith.constant 0 : index
    %184 = vector.load %arg2[%c7_115, %c0_116, %c0_117] : memref<16x8x128xf32, #tpu.memory_space<vmem>>, vector<1x8x128xf32>
    %185 = vector.shape_cast %184 : vector<1x8x128xf32> to vector<8x128xf32>
    %186 = arith.mulf %47, %185 : vector<8x128xf32>
    %187 = arith.addf %183, %186 : vector<8x128xf32>
    %c11_118 = arith.constant 11 : index
    %c0_119 = arith.constant 0 : index
    %c0_120 = arith.constant 0 : index
    %188 = vector.load %arg2[%c11_118, %c0_119, %c0_120] : memref<16x8x128xf32, #tpu.memory_space<vmem>>, vector<1x8x128xf32>
    %189 = vector.shape_cast %188 : vector<1x8x128xf32> to vector<8x128xf32>
    %190 = arith.mulf %48, %189 : vector<8x128xf32>
    %191 = arith.addf %187, %190 : vector<8x128xf32>
    %c15_121 = arith.constant 15 : index
    %c0_122 = arith.constant 0 : index
    %c0_123 = arith.constant 0 : index
    %192 = vector.load %arg2[%c15_121, %c0_122, %c0_123] : memref<16x8x128xf32, #tpu.memory_space<vmem>>, vector<1x8x128xf32>
    %193 = vector.shape_cast %192 : vector<1x8x128xf32> to vector<8x128xf32>
    %194 = arith.mulf %9, %193 : vector<8x128xf32>
    %195 = arith.addf %191, %194 : vector<8x128xf32>
    %c7_124 = arith.constant 7 : index
    %c0_125 = arith.constant 0 : index
    %c0_126 = arith.constant 0 : index
    %196 = vector.load %arg3[%c7_124, %c0_125, %c0_126] : memref<16x8x128xf32, #tpu.memory_space<vmem>>, vector<1x8x128xf32>
    %197 = vector.shape_cast %196 : vector<1x8x128xf32> to vector<8x128xf32>
    %198 = vector.shape_cast %195 : vector<8x128xf32> to vector<1x8x128xf32>
    tpu.vector_store %arg3[%c7_124, %c0_125, %c0_126], %198 {strides = array<i32>} : memref<16x8x128xf32, #tpu.memory_space<vmem>>, vector<1x8x128xf32>,
    %c0_127 = arith.constant 0 : index
    %c0_128 = arith.constant 0 : index
    %c0_129 = arith.constant 0 : index
    %199 = vector.load %arg2[%c0_127, %c0_128, %c0_129] : memref<16x8x128xf32, #tpu.memory_space<vmem>>, vector<1x8x128xf32>
    %200 = vector.shape_cast %199 : vector<1x8x128xf32> to vector<8x128xf32>
    %201 = arith.mulf %49, %200 : vector<8x128xf32>
    %c4_130 = arith.constant 4 : index
    %c0_131 = arith.constant 0 : index
    %c0_132 = arith.constant 0 : index
    %202 = vector.load %arg2[%c4_130, %c0_131, %c0_132] : memref<16x8x128xf32, #tpu.memory_space<vmem>>, vector<1x8x128xf32>
    %203 = vector.shape_cast %202 : vector<1x8x128xf32> to vector<8x128xf32>
    %204 = arith.mulf %50, %203 : vector<8x128xf32>
    %205 = arith.addf %201, %204 : vector<8x128xf32>
    %c8_133 = arith.constant 8 : index
    %c0_134 = arith.constant 0 : index
    %c0_135 = arith.constant 0 : index
    %206 = vector.load %arg2[%c8_133, %c0_134, %c0_135] : memref<16x8x128xf32, #tpu.memory_space<vmem>>, vector<1x8x128xf32>
    %207 = vector.shape_cast %206 : vector<1x8x128xf32> to vector<8x128xf32>
    %208 = arith.mulf %54, %207 : vector<8x128xf32>
    %209 = arith.addf %205, %208 : vector<8x128xf32>
    %c12_136 = arith.constant 12 : index
    %c0_137 = arith.constant 0 : index
    %c0_138 = arith.constant 0 : index
    %210 = vector.load %arg2[%c12_136, %c0_137, %c0_138] : memref<16x8x128xf32, #tpu.memory_space<vmem>>, vector<1x8x128xf32>
    %211 = vector.shape_cast %210 : vector<1x8x128xf32> to vector<8x128xf32>
    %212 = arith.mulf %11, %211 : vector<8x128xf32>
    %213 = arith.addf %209, %212 : vector<8x128xf32>
    %c8_139 = arith.constant 8 : index
    %c0_140 = arith.constant 0 : index
    %c0_141 = arith.constant 0 : index
    %214 = vector.load %arg3[%c8_139, %c0_140, %c0_141] : memref<16x8x128xf32, #tpu.memory_space<vmem>>, vector<1x8x128xf32>
    %215 = vector.shape_cast %214 : vector<1x8x128xf32> to vector<8x128xf32>
    %216 = vector.shape_cast %213 : vector<8x128xf32> to vector<1x8x128xf32>
    tpu.vector_store %arg3[%c8_139, %c0_140, %c0_141], %216 {strides = array<i32>} : memref<16x8x128xf32, #tpu.memory_space<vmem>>, vector<1x8x128xf32>,
    %c1_142 = arith.constant 1 : index
    %c0_143 = arith.constant 0 : index
    %c0_144 = arith.constant 0 : index
    %217 = vector.load %arg2[%c1_142, %c0_143, %c0_144] : memref<16x8x128xf32, #tpu.memory_space<vmem>>, vector<1x8x128xf32>
    %218 = vector.shape_cast %217 : vector<1x8x128xf32> to vector<8x128xf32>
    %219 = arith.mulf %49, %218 : vector<8x128xf32>
    %c5_145 = arith.constant 5 : index
    %c0_146 = arith.constant 0 : index
    %c0_147 = arith.constant 0 : index
    %220 = vector.load %arg2[%c5_145, %c0_146, %c0_147] : memref<16x8x128xf32, #tpu.memory_space<vmem>>, vector<1x8x128xf32>
    %221 = vector.shape_cast %220 : vector<1x8x128xf32> to vector<8x128xf32>
    %222 = arith.mulf %50, %221 : vector<8x128xf32>
    %223 = arith.addf %219, %222 : vector<8x128xf32>
    %c9_148 = arith.constant 9 : index
    %c0_149 = arith.constant 0 : index
    %c0_150 = arith.constant 0 : index
    %224 = vector.load %arg2[%c9_148, %c0_149, %c0_150] : memref<16x8x128xf32, #tpu.memory_space<vmem>>, vector<1x8x128xf32>
    %225 = vector.shape_cast %224 : vector<1x8x128xf32> to vector<8x128xf32>
    %226 = arith.mulf %54, %225 : vector<8x128xf32>
    %227 = arith.addf %223, %226 : vector<8x128xf32>
    %c13_151 = arith.constant 13 : index
    %c0_152 = arith.constant 0 : index
    %c0_153 = arith.constant 0 : index
    %228 = vector.load %arg2[%c13_151, %c0_152, %c0_153] : memref<16x8x128xf32, #tpu.memory_space<vmem>>, vector<1x8x128xf32>
    %229 = vector.shape_cast %228 : vector<1x8x128xf32> to vector<8x128xf32>
    %230 = arith.mulf %11, %229 : vector<8x128xf32>
    %231 = arith.addf %227, %230 : vector<8x128xf32>
    %c9_154 = arith.constant 9 : index
    %c0_155 = arith.constant 0 : index
    %c0_156 = arith.constant 0 : index
    %232 = vector.load %arg3[%c9_154, %c0_155, %c0_156] : memref<16x8x128xf32, #tpu.memory_space<vmem>>, vector<1x8x128xf32>
    %233 = vector.shape_cast %232 : vector<1x8x128xf32> to vector<8x128xf32>
    %234 = vector.shape_cast %231 : vector<8x128xf32> to vector<1x8x128xf32>
    tpu.vector_store %arg3[%c9_154, %c0_155, %c0_156], %234 {strides = array<i32>} : memref<16x8x128xf32, #tpu.memory_space<vmem>>, vector<1x8x128xf32>,
    %c2_157 = arith.constant 2 : index
    %c0_158 = arith.constant 0 : index
    %c0_159 = arith.constant 0 : index
    %235 = vector.load %arg2[%c2_157, %c0_158, %c0_159] : memref<16x8x128xf32, #tpu.memory_space<vmem>>, vector<1x8x128xf32>
    %236 = vector.shape_cast %235 : vector<1x8x128xf32> to vector<8x128xf32>
    %237 = arith.mulf %49, %236 : vector<8x128xf32>
    %c6_160 = arith.constant 6 : index
    %c0_161 = arith.constant 0 : index
    %c0_162 = arith.constant 0 : index
    %238 = vector.load %arg2[%c6_160, %c0_161, %c0_162] : memref<16x8x128xf32, #tpu.memory_space<vmem>>, vector<1x8x128xf32>
    %239 = vector.shape_cast %238 : vector<1x8x128xf32> to vector<8x128xf32>
    %240 = arith.mulf %50, %239 : vector<8x128xf32>
    %241 = arith.addf %237, %240 : vector<8x128xf32>
    %c10_163 = arith.constant 10 : index
    %c0_164 = arith.constant 0 : index
    %c0_165 = arith.constant 0 : index
    %242 = vector.load %arg2[%c10_163, %c0_164, %c0_165] : memref<16x8x128xf32, #tpu.memory_space<vmem>>, vector<1x8x128xf32>
    %243 = vector.shape_cast %242 : vector<1x8x128xf32> to vector<8x128xf32>
    %244 = arith.mulf %54, %243 : vector<8x128xf32>
    %245 = arith.addf %241, %244 : vector<8x128xf32>
    %c14_166 = arith.constant 14 : index
    %c0_167 = arith.constant 0 : index
    %c0_168 = arith.constant 0 : index
    %246 = vector.load %arg2[%c14_166, %c0_167, %c0_168] : memref<16x8x128xf32, #tpu.memory_space<vmem>>, vector<1x8x128xf32>
    %247 = vector.shape_cast %246 : vector<1x8x128xf32> to vector<8x128xf32>
    %248 = arith.mulf %11, %247 : vector<8x128xf32>
    %249 = arith.addf %245, %248 : vector<8x128xf32>
    %c10_169 = arith.constant 10 : index
    %c0_170 = arith.constant 0 : index
    %c0_171 = arith.constant 0 : index
    %250 = vector.load %arg3[%c10_169, %c0_170, %c0_171] : memref<16x8x128xf32, #tpu.memory_space<vmem>>, vector<1x8x128xf32>
    %251 = vector.shape_cast %250 : vector<1x8x128xf32> to vector<8x128xf32>
    %252 = vector.shape_cast %249 : vector<8x128xf32> to vector<1x8x128xf32>
    tpu.vector_store %arg3[%c10_169, %c0_170, %c0_171], %252 {strides = array<i32>} : memref<16x8x128xf32, #tpu.memory_space<vmem>>, vector<1x8x128xf32>,
    %c3_172 = arith.constant 3 : index
    %c0_173 = arith.constant 0 : index
    %c0_174 = arith.constant 0 : index
    %253 = vector.load %arg2[%c3_172, %c0_173, %c0_174] : memref<16x8x128xf32, #tpu.memory_space<vmem>>, vector<1x8x128xf32>
    %254 = vector.shape_cast %253 : vector<1x8x128xf32> to vector<8x128xf32>
    %255 = arith.mulf %49, %254 : vector<8x128xf32>
    %c7_175 = arith.constant 7 : index
    %c0_176 = arith.constant 0 : index
    %c0_177 = arith.constant 0 : index
    %256 = vector.load %arg2[%c7_175, %c0_176, %c0_177] : memref<16x8x128xf32, #tpu.memory_space<vmem>>, vector<1x8x128xf32>
    %257 = vector.shape_cast %256 : vector<1x8x128xf32> to vector<8x128xf32>
    %258 = arith.mulf %50, %257 : vector<8x128xf32>
    %259 = arith.addf %255, %258 : vector<8x128xf32>
    %c11_178 = arith.constant 11 : index
    %c0_179 = arith.constant 0 : index
    %c0_180 = arith.constant 0 : index
    %260 = vector.load %arg2[%c11_178, %c0_179, %c0_180] : memref<16x8x128xf32, #tpu.memory_space<vmem>>, vector<1x8x128xf32>
    %261 = vector.shape_cast %260 : vector<1x8x128xf32> to vector<8x128xf32>
    %262 = arith.mulf %54, %261 : vector<8x128xf32>
    %263 = arith.addf %259, %262 : vector<8x128xf32>
    %c15_181 = arith.constant 15 : index
    %c0_182 = arith.constant 0 : index
    %c0_183 = arith.constant 0 : index
    %264 = vector.load %arg2[%c15_181, %c0_182, %c0_183] : memref<16x8x128xf32, #tpu.memory_space<vmem>>, vector<1x8x128xf32>
    %265 = vector.shape_cast %264 : vector<1x8x128xf32> to vector<8x128xf32>
    %266 = arith.mulf %11, %265 : vector<8x128xf32>
    %267 = arith.addf %263, %266 : vector<8x128xf32>
    %c11_184 = arith.constant 11 : index
    %c0_185 = arith.constant 0 : index
    %c0_186 = arith.constant 0 : index
    %268 = vector.load %arg3[%c11_184, %c0_185, %c0_186] : memref<16x8x128xf32, #tpu.memory_space<vmem>>, vector<1x8x128xf32>
    %269 = vector.shape_cast %268 : vector<1x8x128xf32> to vector<8x128xf32>
    %270 = vector.shape_cast %267 : vector<8x128xf32> to vector<1x8x128xf32>
    tpu.vector_store %arg3[%c11_184, %c0_185, %c0_186], %270 {strides = array<i32>} : memref<16x8x128xf32, #tpu.memory_space<vmem>>, vector<1x8x128xf32>,
    %c12_187 = arith.constant 12 : index
    %c0_188 = arith.constant 0 : index
    %c0_189 = arith.constant 0 : index
    %271 = vector.load %arg2[%c12_187, %c0_188, %c0_189] : memref<16x8x128xf32, #tpu.memory_space<vmem>>, vector<4x8x128xf32>
    %c12_190 = arith.constant 12 : index
    %c0_191 = arith.constant 0 : index
    %c0_192 = arith.constant 0 : index
    %272 = vector.load %arg3[%c12_190, %c0_191, %c0_192] : memref<16x8x128xf32, #tpu.memory_space<vmem>>, vector<4x8x128xf32>
    tpu.vector_store %arg3[%c12_190, %c0_191, %c0_192], %271 {strides = array<i32>} : memref<16x8x128xf32, #tpu.memory_space<vmem>>, vector<4x8x128xf32>,
    return
  }
  func.func @transform_0(%arg0: i32) -> (i32, i32, i32) {
    %c0_i32 = arith.constant 0 : i32
    %c0_i32_0 = arith.constant 0 : i32
    %c0_i32_1 = arith.constant 0 : i32
    return %c0_i32, %arg0, %c0_i32_0 : i32, i32, i32
  }
  func.func @transform_1(%arg0: i32) -> (i32, i32, i32) {
    %c0_i32 = arith.constant 0 : i32
    %c0_i32_0 = arith.constant 0 : i32
    %c0_i32_1 = arith.constant 0 : i32
    return %c0_i32, %arg0, %c0_i32_0 : i32, i32, i32
  }
  func.func @transform_2(%arg0: i32) -> (i32, i32, i32) {
    %c0_i32 = arith.constant 0 : i32
    %c0_i32_0 = arith.constant 0 : i32
    %c0_i32_1 = arith.constant 0 : i32
    return %c0_i32, %arg0, %c0_i32_0 : i32, i32, i32
  }
}

</mosaic_0001>

<bundles_post_ra>
// kernel: _learn_pose_all_impl.1
= control target key start
LH: loop header
LB: loop body
LE: loop exit
PB: predicated region body
PF: predicated region fallthrough
CT: control target
= control target key end

     0   :  { %v548_v46 = vmov 683565275   ;;  %v549_v48 = vmov 2475754826   ;;  %v550_v50 = vmov 2131351028   ;;  %s845_s0 = inlined_call_operand.vmem [shape: f32[6,8,128], index: 0, kind: input, shape index: {}]   ;;  %s846_s2 = inlined_call_operand.vmem [shape: f32[16,8,128], index: 2, kind: output, shape index: {}]   ;;  %s847_s1 = inlined_call_operand.vmem [shape: f32[16,8,128], index: 1, kind: input, shape index: {}]  }
   0x1   :  { %v572_v0 = vld [vmem:[%s845_s0] sm:$0xff]  ;;  %v577_v1 = vld [vmem:[%s845_s0 + $0x8] sm:$0xff]  ;;  %v582_v2 = vld [vmem:[%s845_s0 + $0x10] sm:$0xff]  ;;  %v551_v52 = vmov 2102212464  }
   0x2   :  { %v455_v3 = vld [vmem:[%s845_s0 + $0x18] sm:$0xff]  ;;  %v22_v4 = vmul.f32 %v572_v0, %v572_v0  ;;  %v23_v5 = vmul.f32 %v577_v1, %v577_v1  ;;  %v24_v6 = vmul.f32 %v582_v2, %v582_v2  ;;  %v468_v7 = vld [vmem:[%s847_s1 + $0x60] sm:$0xff]  ;;  %v472_v11 = vld [vmem:[%s847_s1 + $0x68] sm:$0xff]  ;;  %v552_v54 = vmov 920167782  }
   0x3   :  { %v600_v10 = vmul.f32 %v468_v7, %v455_v3  ;;  %526 = vst [vmem:[%s846_s2 + $0x60] sm:$0xff] %v468_v7  ;;  %v610_v13 = vmul.f32 %v472_v11, %v455_v3  ;;  %527 = vst [vmem:[%s846_s2 + $0x68] sm:$0xff] %v472_v11  ;;  %v477_v15 = vld [vmem:[%s847_s1 + $0x70] sm:$0xff]  ;;  %v482_v17 = vld [vmem:[%s847_s1 + $0x78] sm:$0xff]  ;;  %v553_v61 = vmov 1326507024  }
   0x4   :  { %v596_v8 = vadd.f32 %v23_v5, %v22_v4  ;;  %v598_v9 = vadd.f32 %v24_v6, %v23_v5  ;;  %v605_v12 = vadd.f32 %v24_v6, %v22_v4  ;;  %v619_v16 = vmul.f32 %v477_v15, %v455_v3  ;;  %v456_v18 = vld [vmem:[%s845_s0 + $0x20] sm:$0xff]  ;;  %528 = vst [vmem:[%s846_s2 + $0x70] sm:$0xff] %v477_v15  ;;  %v457_v19 = vld [vmem:[%s845_s0 + $0x28] sm:$0xff] }
   0x5   :  { %529 = vst [vmem:[%s846_s2 + $0x78] sm:$0xff] %v482_v17  ;;  %v636_v20 = vmul.f32 %v482_v17, %v455_v3  ;;  %v638_v21 = vmul.f32 %v468_v7, %v456_v18  ;;  %v640_v22 = vmul.f32 %v472_v11, %v456_v18  ;;  %v642_v23 = vmul.f32 %v477_v15, %v456_v18 }
   0x6   :  { %v26_v14 = vadd.f32 %v596_v8, %v24_v6  ;;  %v644_v24 = vmul.f32 %v482_v17, %v456_v18  ;;  %v646_v25 = vmul.f32 %v468_v7, %v457_v19  ;;  %v648_v26 = vmul.f32 %v472_v11, %v457_v19 }
   0x7   :  { %v650_v27 = vmul.f32 %v477_v15, %v457_v19  ;;  %v652_v28 = vmul.f32 %v482_v17, %v457_v19 }
   0x8   :  { %540 = vrsqrt.f32 %v26_v14  ;;  %vm29_vm0 = vcmp.eq.f32.partialorder %v26_v14, inf  ;;  %v32_v30 = vand.u32 2147483648, %v26_v14  ;;  %vm31_vm1 = vcmp.eq.f32.partialorder %v26_v14, 0.0 }
  0x12   :  { %v541_v29 = vpop.eup %540 }
  0x13   :  { %v28_v31 = vmul.f32 %v541_v29, %v26_v14 }
  0x15   :  { %v30_v32 = vsel %vm29_vm0, %v26_v14, %v28_v31 }
  0x16   :  { %v33_v33 = vsel %vm31_vm1, %v32_v30, %v30_v32 }
  0x17   :  { %v654_v34 = vadd.f32 1e-15, %v33_v33 }
  0x19   :  { %v40_v35 = vand.u32 2139095040, %v654_v34  ;;  %v37_v37 = vand.u32 2147483647, %v654_v34  ;;  %vm39_vm9 = vcmp.lt.s32.totalorder %v654_v34, 0  ;;  %vm129_vm1 = vweird.f32 %v654_v34 }
  0x1b   :  { %v41_v36 = vshrl.u32 %v40_v35, 23  ;;  %v44_v40 = vand.u32 8388607, %v37_v37  ;;  %vm38_vm10 = vcmp.le.f32.partialorder %v37_v37, 0.7853982 }
  0x1d   :  { %v458_v38 = vadd.s32 4294967169, %v41_v36  ;;  %v45_v43 = vor.u32 8388608, %v44_v40 }
  0x1f   :  { %v47_v39 = vadd.s32 1, %v458_v38  ;;  %v85_v63 = vshll.u32 %v45_v43, 8 }
  0x21   :  { %vm48_vm2 = vcmp.gt.s32.totalorder %v47_v39, 0 }
  0x22   :  { %v49_v41 = vsel %vm48_vm2, %v47_v39, 0 }
  0x23   :  { %v51_v42 = vand.u32 31, %v49_v41  ;;  %v50_v44 = vshrl.u32 %v49_v41, 5 }
  0x25   :  { %v52_v45 = vsub.s32 32, %v51_v42  ;;  %v54_v47 = vshll.u32 %v548_v46, %v51_v42  ;;  %v57_v49 = vshll.u32 %v549_v48, %v51_v42  ;;  %v60_v51 = vshll.u32 %v550_v50, %v51_v42 }
  0x26   :  { %v63_v53 = vshll.u32 %v551_v52, %v51_v42  ;;  %v66_v55 = vshll.u32 %v552_v54, %v51_v42  ;;  %vm69_vm3 = vcmp.lt.s32.totalorder %v50_v44, 1  ;;  %vm72_vm4 = vcmp.lt.s32.totalorder %v50_v44, 4 }
  0x27   :  { %v53_v56 = vshrl.u32 %v548_v46, %v52_v45  ;;  %v55_v57 = vshrl.u32 %v549_v48, %v52_v45  ;;  %v58_v58 = vshrl.u32 %v550_v50, %v52_v45  ;;  %v61_v59 = vshrl.u32 %v551_v52, %v52_v45 }
  0x28   :  { %v64_v60 = vshrl.u32 %v552_v54, %v52_v45  ;;  %v67_v62 = vshrl.u32 %v553_v61, %v52_v45  ;;  %vm70_vm5 = vcmp.lt.s32.totalorder %v50_v44, 2  ;;  %vm71_vm6 = vcmp.lt.s32.totalorder %v50_v44, 3 }
  0x29   :  { %v56_v3 = vor.u32 %v55_v57, %v54_v47  ;;  %v59_v4 = vor.u32 %v58_v58, %v57_v49  ;;  %v62_v5 = vor.u32 %v61_v59, %v60_v51 }
  0x2a   :  { %v65_v6 = vor.u32 %v64_v60, %v63_v53  ;;  %v68_v7 = vor.u32 %v67_v62, %v66_v55 }
  0x2b   :  { %v73_v11 = vsel %vm69_vm3, %v53_v56, %v56_v3  ;;  %v74_v14 = vsel %vm72_vm4, %v62_v5, 2102212464  ;;  %v77_v15 = vsel %vm69_vm3, %v56_v3, %v59_v4  ;;  %v81_v17 = vsel %vm69_vm3, %v59_v4, %v62_v5 }
  0x2c   :  { %v75_v18 = vsel %vm71_vm6, %v59_v4, %v74_v14  ;;  %v78_v19 = vsel %vm72_vm4, %v65_v6, 920167782  ;;  %v82_v29 = vsel %vm72_vm4, %v68_v7, 1326507024 }
  0x2d   :  { %v79_v30 = vsel %vm71_vm6, %v62_v5, %v78_v19  ;;  %v83_v31 = vsel %vm71_vm6, %v65_v6, %v82_v29  ;;  %v76_v32 = vsel %vm70_vm5, %v73_v11, %v75_v18 }
  0x2e   :  { %v80_v33 = vsel %vm70_vm5, %v77_v15, %v79_v30  ;;  %v84_v35 = vsel %vm70_vm5, %v81_v17, %v83_v31  ;;  %v92_v41 = vmul.u32 %v85_v63, %v76_v32 }
  0x2f   :  { %v660_v36 = vmul.u32.u64.low %v85_v63, %v84_v35  ;;  %v661_v38 = vmul.u32.u64.high %v85_v63, %v84_v35, %v660_v36  ;;  %v663_v39 = vmul.u32.u64.low %v85_v63, %v80_v33  ;;  %v664_v40 = vmul.u32.u64.high %v85_v63, %v80_v33, %v663_v39 }
  0x31   :  { %vm94_vm7 = vc.u32 %v661_v38, %v663_v39  ;;  %v95_v42 = vadd.s32 1, %v664_v40  ;;  %v93_v53 = vadd.s32 %v663_v39, %v661_v38 }
  0x33   :  { %v96_v43 = vsel %vm94_vm7, %v95_v42, %v664_v40 }
  0x34   :  { %v97_v44 = vadd.s32 %v96_v43, %v92_v41 }
  0x36   :  { %v98_v45 = vadd.s32 536870912, %v97_v44 }
  0x38   :  { %v99_v46 = vshrl.u32 %v98_v45, 30 }
  0x3a   :  { %v100_v47 = vshll.u32 %v99_v46, 30  ;;  %v123_v5 = vsub.s32 4, %v99_v46 }
  0x3c   :  { %v101_v48 = vsub.s32 %v97_v44, %v100_v47  ;;  %v124_v11 = vsel %vm39_vm9, %v123_v5, %v99_v46 }
  0x3d   :  { %v126_v15 = vsel %vm38_vm10, 0, %v124_v11  ;;  %v745_v11 = vld [vmem:[%s847_s1 + $0x50] sm:$0xff] }
  0x3e   :  { %v103_v49 = vsub.s32 0, %v101_v48  ;;  %v130_v17 = vadd.s32 3, %v126_v15  ;;  %v235_v19 = vand.u32 3, %v126_v15 }
  0x40   :  { %v459_v50 = vmin.u32 %v103_v49, %v101_v48  ;;  %v131_v18 = vand.u32 3, %v130_v17  ;;  %vm240_vm12 = vcmp.eq.s32.totalorder %v235_v19, 2  ;;  %vm237_vm14 = vcmp.eq.s32.totalorder %v235_v19, 0 }
  0x41   :  { %vm236_vm0 = vcmp.lt.s32.totalorder %v235_v19, 2 }
  0x42   :  { %v105_v51 = vclz %v459_v50  ;;  %vm136_vm11 = vcmp.eq.s32.totalorder %v131_v18, 2  ;;  %vm133_vm13 = vcmp.eq.s32.totalorder %v131_v18, 0  ;;  %vm132_vm15 = vcmp.lt.s32.totalorder %v131_v18, 2 }
  0x44   :  { %v460_v52 = vadd.s32 4294967294, %v105_v51  ;;  %v684_v51 = vld [vmem:[%s847_s1] sm:$0xff] }
  0x46   :  { %vm461_vm8 = vcmp.lt.s32.totalorder %v460_v52, 0 }
  0x47   :  { %v108_v54 = vsel %vm461_vm8, 0, %v460_v52  ;;  %v689_v52 = vld [vmem:[%s847_s1 + $0x20] sm:$0xff] }
  0x48   :  { %v109_v55 = vsub.s32 32, %v108_v54  ;;  %v110_v56 = vshll.u32 %v101_v48, %v108_v54  ;;  %v113_v57 = vsub.s32 4294967266, %v108_v54 }
  0x4a   :  { %v111_v58 = vshrl.u32 %v93_v53, %v109_v55  ;;  %v114_v59 = vadd.s32 127, %v113_v57  ;;  %v694_v53 = vld [vmem:[%s847_s1 + $0x8] sm:$0xff]  ;;  %v707_v57 = vld [vmem:[%s847_s1 + $0x40] sm:$0xff] }
  0x4c   :  { %v112_v60 = vor.u32 %v111_v58, %v110_v56  ;;  %v115_v61 = vshll.u32 %v114_v59, 23  ;;  %v712_v58 = vld [vmem:[%s847_s1 + $0x10] sm:$0xff]  ;;  %v727_v59 = vld [vmem:[%s847_s1 + $0x48] sm:$0xff] }
  0x4e   :  { %v116_v62 = vor.u32 4788187, %v115_v61  ;;  %v119_v63 = vcvt.s32.f32 %v112_v60  ;;  %v732_v60 = vld [vmem:[%s847_s1 + $0x30] sm:$0xff] }
  0x50   :  { %v117_v3 = vand.u32 2147483647, %v116_v62 }
  0x52   :  { %v120_v4 = vmul.f32 %v119_v63, %v117_v3 }
  0x54   :  { %v121_v6 = vxor.u32 2147483648, %v120_v4 }
  0x56   :  { %v122_v7 = vsel %vm39_vm9, %v121_v6, %v120_v4 }
  0x57   :  { %v125_v14 = vsel %vm38_vm10, %v654_v34, %v122_v7 }
  0x58   :  { %542 = vcosq.f32 %v125_v14 }
  0x59   :  { %544 = vsinq.f32 %v125_v14 }
  0x5a   :  { %546 = vrcp.f32 %v654_v34 }
  0x62   :  { %v543_v29 = vpop.eup %542 }
  0x63   :  { %v545_v30 = vpop.eup %544  ;;  %v137_v31 = vxor.u32 2147483648, %v543_v29 }
  0x64   :  { %v547_v37 = vpop.eup %546  ;;  %v134_v32 = vxor.u32 2147483648, %v545_v30 }
  0x65   :  { %v138_v33 = vsel %vm136_vm11, %v137_v31, %v545_v30  ;;  %v242_v35 = vsel %vm240_vm12, %v137_v31, %v545_v30  ;;  %v246_v41 = vmul.f32 %v547_v37, %v547_v37 }
  0x66   :  { %v135_v36 = vsel %vm133_vm13, %v543_v29, %v134_v32  ;;  %v239_v38 = vsel %vm237_vm14, %v543_v29, %v134_v32 }
  0x67   :  { %v139_v39 = vsel %vm132_vm15, %v135_v36, %v138_v33  ;;  %v243_v40 = vsel %vm236_vm0, %v239_v38, %v242_v35 }
  0x68   :  { %v140_v42 = vsel %vm129_vm1, nan, %v139_v39  ;;  %v244_v43 = vsel %vm129_vm1, nan, %v243_v40 }
  0x69   :  { %v141_v44 = vmul.f32 %v547_v37, %v140_v42  ;;  %v245_v45 = vsub.f32 1.0, %v244_v43 }
  0x6b   :  { %v247_v46 = vmul.f32 %v246_v41, %v245_v45  ;;  %v250_v47 = vmul.f32 %v582_v2, %v141_v44  ;;  %v698_v54 = vmul.f32 %v577_v1, %v141_v44  ;;  %v248_v61 = vmul.f32 %v141_v44, %v572_v0 }
  0x6d   :  { %v251_v48 = vmul.f32 %v247_v46, %v572_v0  ;;  %v257_v49 = vmul.f32 %v598_v9, %v247_v46  ;;  %v252_v34 = vmul.f32 %v577_v1, %v247_v46  ;;  %v263_v50 = vmul.f32 %v605_v12, %v247_v46  ;;  %v750_v0 = vld [vmem:[%s847_s1 + $0x38] sm:$0xff] }
  0x6e   :  { %v268_v9 = vmul.f32 %v247_v46, %v596_v8  ;;  %v717_v8 = vld [vmem:[%s847_s1 + $0x18] sm:$0xff] }
  0x6f   :  { %v253_v12 = vmul.f32 %v577_v1, %v251_v48  ;;  %v702_v55 = vmul.f32 %v582_v2, %v251_v48  ;;  %v258_v56 = vsub.f32 1.0, %v257_v49  ;;  %v722_v1 = vld [vmem:[%s847_s1 + $0x28] sm:$0xff]  ;;  %v255_v62 = vmul.f32 %v582_v2, %v252_v34  ;;  %v755_v2 = vld [vmem:[%s847_s1 + $0x58] sm:$0xff] }
  0x70   :  { %v264_v63 = vsub.f32 1.0, %v263_v50  ;;  %v736_v3 = vsub.f32 1.0, %v268_v9 }
  0x71   :  { %v259_v4 = vsub.f32 %v253_v12, %v250_v47  ;;  %v260_v5 = vadd.f32 %v702_v55, %v698_v54  ;;  %v271_v6 = vmul.f32 %v684_v51, %v258_v56  ;;  %v287_v7 = vmul.f32 %v694_v53, %v258_v56 }
  0x72   :  { %v304_v14 = vmul.f32 %v712_v58, %v258_v56  ;;  %v321_v15 = vmul.f32 %v717_v8, %v258_v56  ;;  %v261_v17 = vadd.f32 %v253_v12, %v250_v47  ;;  %v265_v18 = vsub.f32 %v255_v62, %v248_v61 }
  0x73   :  { %v274_v19 = vmul.f32 %v689_v52, %v259_v4  ;;  %v278_v29 = vmul.f32 %v707_v57, %v260_v5  ;;  %v290_v30 = vmul.f32 %v722_v1, %v259_v4  ;;  %v294_v31 = vmul.f32 %v727_v59, %v260_v5 }
  0x74   :  { %v307_v37 = vmul.f32 %v732_v60, %v259_v4  ;;  %v311_v32 = vmul.f32 %v745_v11, %v260_v5  ;;  %v324_v33 = vmul.f32 %v750_v0, %v259_v4  ;;  %v328_v35 = vmul.f32 %v755_v2, %v260_v5 }
  0x75   :  { %v275_v36 = vadd.f32 %v274_v19, %v271_v6  ;;  %v291_v38 = vadd.f32 %v290_v30, %v287_v7  ;;  %v337_v39 = vmul.f32 %v684_v51, %v261_v17  ;;  %v339_v40 = vmul.f32 %v689_v52, %v264_v63 }
  0x76   :  { %v308_v41 = vadd.f32 %v307_v37, %v304_v14  ;;  %v325_v42 = vadd.f32 %v324_v33, %v321_v15  ;;  %v342_v43 = vmul.f32 %v707_v57, %v265_v18  ;;  %v350_v44 = vmul.f32 %v694_v53, %v261_v17 }
  0x77   :  { %v279_v45 = vadd.f32 %v278_v29, %v275_v36  ;;  %v295_v46 = vadd.f32 %v294_v31, %v291_v38  ;;  %v340_v47 = vadd.f32 %v339_v40, %v337_v39  ;;  %v352_v48 = vmul.f32 %v722_v1, %v264_v63 }
  0x78   :  { %v312_v49 = vadd.f32 %v311_v32, %v308_v41  ;;  %v329_v34 = vadd.f32 %v328_v35, %v325_v42  ;;  %v355_v50 = vmul.f32 %v727_v59, %v265_v18  ;;  %v363_v9 = vmul.f32 %v712_v58, %v261_v17 }
  0x79   :  { %v283_v12 = vadd.f32 %v600_v10, %v279_v45  ;;  %v299_v56 = vadd.f32 %v610_v13, %v295_v46  ;;  %v343_v4 = vadd.f32 %v342_v43, %v340_v47  ;;  %v353_v5 = vadd.f32 %v352_v48, %v350_v44 }
  0x7a   :  { %v316_v6 = vadd.f32 %v619_v16, %v312_v49  ;;  %v333_v7 = vadd.f32 %v636_v20, %v329_v34  ;;  %v365_v14 = vmul.f32 %v732_v60, %v264_v63  ;;  %v368_v15 = vmul.f32 %v745_v11, %v265_v18 }
  0x7b   :  { %284 = vst [vmem:[%s846_s2] sm:$0xff] %v283_v12  ;;  %473 = vst [vmem:[%s846_s2 + $0x8] sm:$0xff] %v299_v56  ;;  %v346_v10 = vadd.f32 %v638_v21, %v343_v4  ;;  %v356_v13 = vadd.f32 %v355_v50, %v353_v5  ;;  %v376_v19 = vmul.f32 %v717_v8, %v261_v17 }
  0x7c   :  { %v378_v16 = vmul.f32 %v750_v0, %v264_v63  ;;  %478 = vst [vmem:[%s846_s2 + $0x10] sm:$0xff] %v316_v6  ;;  %483 = vst [vmem:[%s846_s2 + $0x18] sm:$0xff] %v333_v7  ;;  %v366_v20 = vadd.f32 %v365_v14, %v363_v9  ;;  %v381_v29 = vmul.f32 %v755_v2, %v265_v18 }
  0x7d   :  { %v266_v30 = vsub.f32 %v702_v55, %v698_v54  ;;  %v267_v21 = vadd.f32 %v255_v62, %v248_v61  ;;  %487 = vst [vmem:[%s846_s2 + $0x20] sm:$0xff] %v346_v10  ;;  %v359_v63 = vadd.f32 %v640_v22, %v356_v13  ;;  %v394_v31 = vmul.f32 %v707_v57, %v736_v3 }
  0x7e   :  { %v379_v17 = vadd.f32 %v378_v16, %v376_v19  ;;  %v407_v37 = vmul.f32 %v727_v59, %v736_v3  ;;  %v369_v32 = vadd.f32 %v368_v15, %v366_v20 }
  0x7f   :  { %v389_v18 = vmul.f32 %v684_v51, %v266_v30  ;;  %v391_v33 = vmul.f32 %v689_v52, %v267_v21  ;;  %v402_v54 = vmul.f32 %v694_v53, %v266_v30  ;;  %492 = vst [vmem:[%s846_s2 + $0x28] sm:$0xff] %v359_v63  ;;  %v404_v22 = vmul.f32 %v722_v1, %v267_v21 }
  0x80   :  { %v382_v55 = vadd.f32 %v381_v29, %v379_v17  ;;  %v415_v61 = vmul.f32 %v712_v58, %v266_v30  ;;  %v417_v57 = vmul.f32 %v732_v60, %v267_v21  ;;  %v372_v59 = vadd.f32 %v642_v23, %v369_v32 }
  0x81   :  { %v392_v62 = vadd.f32 %v391_v33, %v389_v18  ;;  %v420_v51 = vmul.f32 %v745_v11, %v736_v3  ;;  %v428_v52 = vmul.f32 %v717_v8, %v266_v30  ;;  %v405_v35 = vadd.f32 %v404_v22, %v402_v54 }
  0x82   :  { %v385_v53 = vadd.f32 %v644_v24, %v382_v55  ;;  %v418_v36 = vadd.f32 %v417_v57, %v415_v61  ;;  %v430_v38 = vmul.f32 %v750_v0, %v267_v21  ;;  %497 = vst [vmem:[%s846_s2 + $0x30] sm:$0xff] %v372_v59  ;;  %v433_v23 = vmul.f32 %v755_v2, %v736_v3 }
  0x83   :  { %v395_v58 = vadd.f32 %v394_v31, %v392_v62  ;;  %v408_v1 = vadd.f32 %v407_v37, %v405_v35 }
  0x84   :  { %502 = vst [vmem:[%s846_s2 + $0x38] sm:$0xff] %v385_v53  ;;  %v421_v8 = vadd.f32 %v420_v51, %v418_v36  ;;  %v431_v60 = vadd.f32 %v430_v38, %v428_v52 }
  0x85   :  { %v398_v24 = vadd.f32 %v646_v25, %v395_v58  ;;  %v411_v11 = vadd.f32 %v648_v26, %v408_v1 }
  0x86   :  { %v424_v0 = vadd.f32 %v650_v27, %v421_v8  ;;  %v434_v39 = vadd.f32 %v433_v23, %v431_v60 }
  0x87   :  { %506 = vst [vmem:[%s846_s2 + $0x40] sm:$0xff] %v398_v24  ;;  %511 = vst [vmem:[%s846_s2 + $0x48] sm:$0xff] %v411_v11 }
  0x88   :  { %516 = vst [vmem:[%s846_s2 + $0x50] sm:$0xff] %v424_v0  ;;  %v437_v3 = vadd.f32 %v652_v28, %v434_v39 }
  0x8a   :  { %521 = vst [vmem:[%s846_s2 + $0x58] sm:$0xff] %v437_v3 }

</bundles_post_ra>
